<compile_context>
chip_gen: v7x
topology: tpu7x:2x2x1
jax: 0.10.0
libtpu: 0.0.40
codegen_flags: <defaults>
</compile_context>

<pallas_src>
import jax
import jax.numpy as jnp
from jax.experimental import pallas as pl
from jax.experimental.pallas import tpu as pltpu


def fm_kernel(x_ref, o_ref):
    """x_ref: (F, E, bm) VMEM tile; o_ref: (1, bm) float32 VMEM tile."""
    num_fields = x_ref.shape[0]
    x0 = x_ref[0].astype(jnp.float32)       # (E, bm): E on sublanes, batch on lanes
    s = x0                                  # running sum over fields      (VPU)
    ss = x0 * x0                            # running sum of squares       (VPU)
    for f in range(1, num_fields):          # small static trip count -> unrolled
        xf = x_ref[f].astype(jnp.float32)
        s = s + xf
        ss = ss + xf * xf
    cross = s * s - ss                      # (E, bm)
    # Single sublane (XLU) reduce over E; result is already lane-dense (1, bm).
    o_ref[...] = 0.5 * jnp.sum(cross, axis=0, keepdims=True)


def _round_up(x, m):
    return ((x + m - 1) // m) * m


def fm_forward(x, *, bm=None):
    """x: (B, F, E) array. Returns (B, 1) float32, matching the PyTorch FM module."""
    B, F, E = x.shape
    itemsize = jnp.dtype(x.dtype).itemsize
    e_pad = _round_up(max(E, 1), 8)              # sublane padding of E inside VMEM
    per_batch = F * e_pad * itemsize             # VMEM bytes per batch row in a block

    if bm is None:
        target = 2 * 1024 * 1024                 # ~2 MiB input block per grid step
        bm = (target // per_batch) // 128 * 128
    # Keep double-buffered block comfortably inside VMEM on all generations
    # (v7x: 64 MiB physical / 32 MiB scoped default).
    bm_cap = max(128, ((12 * 1024 * 1024) // per_batch) // 128 * 128)
    bm = int(min(max(128, bm), bm_cap))

    bp_min = _round_up(B, 128)
    bm = min(bm, bp_min)
    # v7x has 2 TensorCores: prefer >= 2 "parallel" grid blocks when batch allows.
    if bm >= bp_min and bp_min >= 256:
        bm = _round_up(bp_min // 2, 128)
    Bp = _round_up(B, bm)
    grid = Bp // bm

    if Bp != B:
        x = jnp.pad(x, ((0, Bp - B), (0, 0), (0, 0)))   # zero rows contribute 0

    # Layout plumbing: (Bp, F, E) -> (F, E, Bp) so batch sits on the lane axis.
    xt = jnp.transpose(x, (1, 2, 0))

    out = pl.pallas_call(
        fm_kernel,
        out_shape=jax.ShapeDtypeStruct((1, Bp), jnp.float32),
        grid_spec=pl.GridSpec(
            grid=(grid,),
            in_specs=[pl.BlockSpec((F, E, bm), lambda i: (0, 0, i))],
            out_specs=pl.BlockSpec((1, bm), lambda i: (0, i)),
        ),
        compiler_params=pltpu.CompilerParams(
            dimension_semantics=("parallel",),
        ),
    )(xt)

    return out[0, :B].reshape(B, 1)


def fm_reference(x):
    x = x.astype(jnp.float32)
    square_of_sum = jnp.sum(x, axis=1, keepdims=True) ** 2      # (B, 1, E)
    sum_of_square = jnp.sum(x * x, axis=1, keepdims=True)       # (B, 1, E)
    cross = square_of_sum - sum_of_square
    return 0.5 * jnp.sum(cross, axis=2)                         # (B, 1)


if __name__ == "__main__":
    # Primary small-shape check consistent with the module: (batch, field, embedding).
    B, F, E = 2, 4, 32
    x = jax.random.normal(jax.random.PRNGKey(0), (B, F, E), dtype=jnp.float32)
    out = jax.block_until_ready(fm_forward(x))
    ref = fm_reference(x)
    assert out.shape == (B, 1), out.shape
    assert jnp.allclose(out, ref, atol=1e-4, rtol=1e-4), (out, ref)

    # Secondary check: ragged batch, bf16 input, multi-block "parallel" grid.
    B2, F2, E2 = 272, 3, 20
    x2 = jax.random.normal(jax.random.PRNGKey(1), (B2, F2, E2), dtype=jnp.bfloat16)
    out2 = jax.block_until_ready(fm_forward(x2))
    ref2 = fm_reference(x2)
    assert out2.shape == (B2, 1), out2.shape
    assert jnp.allclose(out2, ref2, atol=2e-3, rtol=2e-3), (out2, ref2)

    print("KERNEL_OK")
</pallas_src>

<mosaic_0001>
module attributes {stable_mosaic.version = 11 : i64} {
  func.func @fm_kernel(%arg0: i32, %arg1: memref<4x32x128xf32, #tpu.memory_space<vmem>>, %arg2: memref<1x128xf32, #tpu.memory_space<vmem>>) attributes {dimension_semantics = [#tpu.dimension_semantics<parallel>], iteration_bounds = array<i64: 1>, scalar_prefetch = 0 : i64, scratch_operands = 0 : i64, tpu.core_type = #tpu.core_type<tc>, window_params = [{transform_indices = @transform_0, window_bounds = array<i64: 4, 32, 128>}, {transform_indices = @transform_1, window_bounds = array<i64: 1, 128>}]} {
    %c0 = arith.constant 0 : index
    %c0_0 = arith.constant 0 : index
    %c0_1 = arith.constant 0 : index
    %0 = vector.load %arg1[%c0, %c0_0, %c0_1] : memref<4x32x128xf32, #tpu.memory_space<vmem>>, vector<1x32x128xf32>
    %1 = vector.shape_cast %0 : vector<1x32x128xf32> to vector<32x128xf32>
    %2 = arith.mulf %1, %1 : vector<32x128xf32>
    %c1 = arith.constant 1 : index
    %c0_2 = arith.constant 0 : index
    %c0_3 = arith.constant 0 : index
    %3 = vector.load %arg1[%c1, %c0_2, %c0_3] : memref<4x32x128xf32, #tpu.memory_space<vmem>>, vector<1x32x128xf32>
    %4 = vector.shape_cast %3 : vector<1x32x128xf32> to vector<32x128xf32>
    %5 = arith.addf %1, %4 : vector<32x128xf32>
    %6 = arith.mulf %4, %4 : vector<32x128xf32>
    %7 = arith.addf %2, %6 : vector<32x128xf32>
    %c2 = arith.constant 2 : index
    %c0_4 = arith.constant 0 : index
    %c0_5 = arith.constant 0 : index
    %8 = vector.load %arg1[%c2, %c0_4, %c0_5] : memref<4x32x128xf32, #tpu.memory_space<vmem>>, vector<1x32x128xf32>
    %9 = vector.shape_cast %8 : vector<1x32x128xf32> to vector<32x128xf32>
    %10 = arith.addf %5, %9 : vector<32x128xf32>
    %11 = arith.mulf %9, %9 : vector<32x128xf32>
    %12 = arith.addf %7, %11 : vector<32x128xf32>
    %c3 = arith.constant 3 : index
    %c0_6 = arith.constant 0 : index
    %c0_7 = arith.constant 0 : index
    %13 = vector.load %arg1[%c3, %c0_6, %c0_7] : memref<4x32x128xf32, #tpu.memory_space<vmem>>, vector<1x32x128xf32>
    %14 = vector.shape_cast %13 : vector<1x32x128xf32> to vector<32x128xf32>
    %15 = arith.addf %10, %14 : vector<32x128xf32>
    %16 = arith.mulf %14, %14 : vector<32x128xf32>
    %17 = arith.addf %12, %16 : vector<32x128xf32>
    %18 = arith.mulf %15, %15 : vector<32x128xf32>
    %19 = arith.subf %18, %17 : vector<32x128xf32>
    %cst = arith.constant dense<0.000000e+00> : vector<128xf32>
    %20 = vector.multi_reduction <add>, %19, %cst [0] : vector<32x128xf32> to vector<128xf32>
    %21 = vector.shape_cast %20 : vector<128xf32> to vector<1x128xf32>
    %cst_8 = arith.constant 5.000000e-01 : f32
    %22 = vector.broadcast %cst_8 : f32 to vector<1x128xf32>
    %23 = arith.mulf %22, %21 : vector<1x128xf32>
    %c0_9 = arith.constant 0 : index
    %c0_10 = arith.constant 0 : index
    %24 = vector.load %arg2[%c0_9, %c0_10] : memref<1x128xf32, #tpu.memory_space<vmem>>, vector<1x128xf32>
    tpu.vector_store %arg2[%c0_9, %c0_10], %23 {strides = array<i32>} : memref<1x128xf32, #tpu.memory_space<vmem>>, vector<1x128xf32>,
    return
  }
  func.func @transform_0(%arg0: i32) -> (i32, i32, i32) {
    %c0_i32 = arith.constant 0 : i32
    %c0_i32_0 = arith.constant 0 : i32
    %c0_i32_1 = arith.constant 0 : i32
    return %c0_i32, %c0_i32_0, %arg0 : i32, i32, i32
  }
  func.func @transform_1(%arg0: i32) -> (i32, i32) {
    %c0_i32 = arith.constant 0 : i32
    %c0_i32_0 = arith.constant 0 : i32
    return %c0_i32, %arg0 : i32, i32
  }
}

</mosaic_0001>

<bundles_post_ra>
// kernel: tpu_custom_call.1
= control target key start
LH: loop header
LB: loop body
LE: loop exit
PB: predicated region body
PF: predicated region fallthrough
CT: control target
= control target key end

     0   :  { %6 = vsyncpa [#allocation3], 0  ;;  %s206_s0 = inlined_call_operand.hbm [shape: f32[4,32,128], index: 0, kind: input, shape index: {}]   ;;  %s207_s1 = inlined_call_operand.hbm [shape: f32[1,128], index: 1, kind: output, shape index: {}]  }
   0x1   :  { %7 = vsyncpa [#allocation4], 0  ;;  %s168_s6 = smov [#allocation2]   ;;  %s120_s10 = scalar_lea.hbm %s206_s0, 2048 }
   0x2   :  { %s13_s7 = sshll.u32 %s168_s6, 4  ;;  %p121_p0 = scmp.ne.s32.totalorder %s206_s0, %s120_s10  ;;  %s14_s7 = int_to_ptr.vmem [resolvable:$true] %s13_s7 }
   0x3   :  { %p124_p1 = scmp.lt.u32.totalorder %s120_s10, %s206_s0 }
   0x5   :  { %p126_p2 = pnand %p124_p1, %p121_p0 }
   0x7   :  { %129 = shalt.err (!%p126_p2)
}
   0x8   :  { %s130_s15 = scalar_lea.vmem %s14_s7, 2048  ;;  %p135_p4 = scmp.lt.s32.totalorder %s14_s7, %s14_s7 }
   0x9   :  { %p131_p3 = scmp.ne.s32.totalorder %s14_s7, %s130_s15  ;;  %p136_p5 = scmp.lt.s32.totalorder %s130_s15, %s130_s15 }
   0xb   :  { %p137_p6 = por %p136_p5, %p135_p4 }
   0xd   :  { %p138_p7 = pnand %p137_p6, %p131_p3 }
   0xf   :  { %141 = shalt.err (!%p138_p7)
}
  0x10   :  { %s169_s16 = smov 128   ;;  %s170_s17 = smov 8  }
  0x11   :  { %19 = dma.hbm_to_vmem [thread:$0]  %s206_s0, 2048, %s14_s7, [#allocation3], %s169_s16, %s169_s16, %s170_s17  }
  0x12   :  { %164 = dma.done.wait [#allocation3], 2048  }
  0x13   :  { %165 = vsyncadd [#allocation3], 4294965248  ;;  %v23_v0 = vld [vmem:[#allocation2] sm:$0xff]  ;;  %v24_v1 = vld [vmem:[#allocation2 + $0x8] sm:$0xff]  ;;  %s171_s0 = smov [#allocation5]  }
  0x14   :  { %v25_v2 = vld [vmem:[#allocation2 + $0x10] sm:$0xff]  ;;  %v26_v3 = vld [vmem:[#allocation2 + $0x18] sm:$0xff]  ;;  %v27_v4 = vmul.f32 %v23_v0, %v23_v0  ;;  %v28_v5 = vmul.f32 %v24_v1, %v24_v1  ;;  %v32_v7 = vld [vmem:[#allocation2 + $0x20] sm:$0xff]  ;;  %s107_s20 = sshll.u32 %s171_s0, 4  ;;  %s108_s20 = int_to_ptr.vmem [resolvable:$true] %s107_s20 }
  0x15   :  { %v29_v6 = vmul.f32 %v25_v2, %v25_v2  ;;  %v33_v8 = vld [vmem:[#allocation2 + $0x28] sm:$0xff]  ;;  %v30_v9 = vmul.f32 %v26_v3, %v26_v3  ;;  %v34_v10 = vld [vmem:[#allocation2 + $0x30] sm:$0xff]  ;;  %v35_v11 = vld [vmem:[#allocation2 + $0x38] sm:$0xff]  ;;  %v36_v12 = vadd.f32 %v32_v7, %v23_v0  ;;  %v40_v14 = vmul.f32 %v32_v7, %v32_v7  ;;  %s142_s21 = scalar_lea.vmem %s108_s20, 16  ;;  %s146_s22 = scalar_lea.vmem %s108_s20, 32 }
  0x16   :  { %v37_v13 = vadd.f32 %v33_v8, %v24_v1  ;;  %v49_v15 = vld [vmem:[#allocation2 + $0x40] sm:$0xff]  ;;  %v38_v16 = vadd.f32 %v34_v10, %v25_v2  ;;  %v39_v17 = vadd.f32 %v35_v11, %v26_v3  ;;  %v41_v18 = vmul.f32 %v33_v8, %v33_v8  ;;  %v50_v20 = vld [vmem:[#allocation2 + $0x48] sm:$0xff]  ;;  %v51_v21 = vld [vmem:[#allocation2 + $0x50] sm:$0xff]  ;;  %p143_p8 = scmp.ne.s32.totalorder %s108_s20, %s142_s21  ;;  %p147_p9 = scmp.lt.s32.totalorder %s108_s20, %s108_s20 }
  0x17   :  { %v42_v19 = vmul.f32 %v34_v10, %v34_v10  ;;  %v52_v22 = vld [vmem:[#allocation2 + $0x58] sm:$0xff]  ;;  %v43_v23 = vmul.f32 %v35_v11, %v35_v11  ;;  %v44_v24 = vadd.f32 %v40_v14, %v27_v4  ;;  %v53_v25 = vadd.f32 %v49_v15, %v36_v12  ;;  %v66_v27 = vld [vmem:[#allocation2 + $0x60] sm:$0xff]  ;;  %v67_v28 = vld [vmem:[#allocation2 + $0x68] sm:$0xff]  ;;  %p148_p10 = scmp.lt.s32.totalorder %s146_s22, %s142_s21 }
  0x18   :  { %v54_v26 = vadd.f32 %v50_v20, %v37_v13  ;;  %v68_v29 = vld [vmem:[#allocation2 + $0x70] sm:$0xff]  ;;  %v45_v30 = vadd.f32 %v41_v18, %v28_v5  ;;  %v55_v32 = vadd.f32 %v51_v21, %v38_v16  ;;  %v56_v33 = vadd.f32 %v52_v22, %v39_v17  ;;  %v69_v34 = vld [vmem:[#allocation2 + $0x78] sm:$0xff] }
  0x19   :  { %v46_v31 = vadd.f32 %v42_v19, %v29_v6  ;;  %v47_v35 = vadd.f32 %v43_v23, %v30_v9  ;;  %v57_v36 = vmul.f32 %v49_v15, %v49_v15  ;;  %v58_v37 = vmul.f32 %v50_v20, %v50_v20  ;;  %p149_p11 = por %p148_p10, %p147_p9 }
  0x1a   :  { %v59_v38 = vmul.f32 %v51_v21, %v51_v21  ;;  %v60_v39 = vmul.f32 %v52_v22, %v52_v22  ;;  %v70_v40 = vadd.f32 %v66_v27, %v53_v25  ;;  %v71_v41 = vadd.f32 %v67_v28, %v54_v26 }
  0x1b   :  { %v72_v42 = vadd.f32 %v68_v29, %v55_v32  ;;  %v61_v43 = vadd.f32 %v57_v36, %v44_v24  ;;  %v62_v44 = vadd.f32 %v58_v37, %v45_v30  ;;  %v73_v46 = vadd.f32 %v69_v34, %v56_v33  ;;  %p150_p12 = pnand %p149_p11, %p143_p8 }
  0x1c   :  { %v63_v45 = vadd.f32 %v59_v38, %v46_v31  ;;  %v64_v47 = vadd.f32 %v60_v39, %v47_v35  ;;  %v74_v48 = vmul.f32 %v66_v27, %v66_v27  ;;  %v75_v49 = vmul.f32 %v67_v28, %v67_v28 }
  0x1d   :  { %v76_v50 = vmul.f32 %v68_v29, %v68_v29  ;;  %v77_v51 = vmul.f32 %v69_v34, %v69_v34  ;;  %v82_v52 = vmul.f32 %v70_v40, %v70_v40  ;;  %v83_v53 = vmul.f32 %v71_v41, %v71_v41 }
  0x1e   :  { %v84_v54 = vmul.f32 %v72_v42, %v72_v42  ;;  %v78_v55 = vadd.f32 %v74_v48, %v61_v43  ;;  %v79_v56 = vadd.f32 %v75_v49, %v62_v44  ;;  %v85_v58 = vmul.f32 %v73_v46, %v73_v46 }
  0x1f   :  { %v80_v57 = vadd.f32 %v76_v50, %v63_v45  ;;  %v81_v59 = vadd.f32 %v77_v51, %v64_v47 }
  0x20   :  { %v86_v60 = vsub.f32 %v82_v52, %v78_v55  ;;  %v87_v61 = vsub.f32 %v83_v53, %v79_v56 }
  0x21   :  { %v88_v62 = vsub.f32 %v84_v54, %v80_v57  ;;  %v89_v63 = vsub.f32 %v85_v58, %v81_v59 }
  0x22   :  { %v90_v0 = vadd.f32 %v87_v61, %v86_v60 }
  0x24   :  { %v91_v1 = vadd.f32 %v90_v0, %v88_v62 }
  0x26   :  { %v92_v2 = vadd.f32 %v91_v1, %v89_v63 }
  0x28   :  { %v93_v3 = vrot.slane %v92_v2, 4 }
  0x2a   :  { %v94_v4 = vadd.f32 %v93_v3, %v92_v2 }
  0x2c   :  { %v95_v5 = vrot.slane %v94_v4, 2 }
  0x2e   :  { %v96_v6 = vadd.f32 %v95_v5, %v94_v4 }
  0x30   :  { %v97_v7 = vrot.slane %v96_v6, 1 }
  0x32   :  { %v98_v8 = vadd.f32 %v97_v7, %v96_v6 }
  0x34   :  { %v99_v9 = vmul.f32 0.5, %v98_v8 }
  0x36   :  { %100 = vst [vmem:[#allocation5] sm:$0x1] %v99_v9 }
  0x37   :  { %153 = shalt.err (!%p150_p12)
}
  0x38   :  { %s154_s25 = scalar_lea.hbm %s207_s1, 16 }
  0x39   :  { %p155_p13 = scmp.ne.s32.totalorder %s207_s1, %s154_s25  ;;  %p158_p0 = scmp.lt.u32.totalorder %s154_s25, %s207_s1 }
  0x3b   :  { %p160_p1 = pnand %p158_p0, %p155_p13 }
  0x3d   :  { %163 = shalt.err (!%p160_p1)
}
  0x3e   :  { %110 = dma.vmem_to_hbm [thread:$0]  %s108_s20, 16, %s207_s1, [#allocation4]  }
  0x3f   :  { %166 = dma.done.wait [#allocation4], 16  }
  0x40   :  { %167 = vsyncadd [#allocation4], 4294967280 }
  0x41   :  { %114 = vsyncpa [#allocation3], 1 }
  0x42   :  { %115 = vsyncpa [#allocation4], 1 }

</bundles_post_ra>
